<compile_context>
chip_gen: v6e
topology: v6e:2x2x1
jax: 0.10.0
libtpu: 0.0.40
codegen_flags: <defaults>
</compile_context>

<pallas_src>
import numpy as np
import jax
import jax.numpy as jnp
from jax import lax
from jax.experimental import pallas as pl
from jax.experimental.pallas import tpu as pltpu

P = 8    # population size
L = 16   # tour length (== number of cities)
N = 16   # number of cities
B = 8    # batch of independent (population, child) replacement instances


def replacement_kernel(pop_ref, child_ref, dist_ref, newpop_ref, newfit_ref):
    pop = pop_ref[...]          # (P, L)    int32
    child = child_ref[...]      # (1, L)    int32
    dist_flat = dist_ref[...]   # (1, N*N)  f32, row-major flattened distances

    # All P+1 chromosomes of this instance in one block.
    genes = jnp.concatenate([pop, child], axis=0)                       # (P+1, L)
    # Next city along the tour: single block-wide rotate by -1 on the tour axis.
    genes_next = jnp.concatenate([genes[:, 1:], genes[:, :1]], axis=1)  # (P+1, L)

    # Flat gather index into the row-major flattened distance matrix:
    #   flat[p, l] = genes[p, l] * N + genes[p, (l+1) % L]   in [0, N*N)
    flat = genes * N + genes_next                                       # (P+1, L)

    # Lane-dense one-hot gather (pure VPU/XLU, no MXU): last dim N*N = 256
    # = two full lane tiles.
    iota_flat = lax.broadcasted_iota(jnp.int32, (P + 1, L, N * N), 2)
    contrib = jnp.where(flat[:, :, None] == iota_flat,
                        dist_flat.reshape(1, 1, N * N),
                        0.0)                                            # (P+1,L,NN)

    # Per-position edge length (exactly one nonzero per row), then tour length.
    fit = jnp.sum(jnp.sum(contrib, axis=2), axis=1, keepdims=True)      # (P+1, 1)

    pop_fit = fit[0:P, :]                                   # (P, 1)
    child_fit = fit[P:P + 1, :]                             # (1, 1)

    # Steady-state replacement: child replaces the (first) worst member iff
    # strictly better (smaller tour length).
    worst_fit = jnp.max(pop_fit)
    idx = lax.broadcasted_iota(jnp.int32, (P, 1), 0)
    worst_idx = jnp.min(jnp.where(pop_fit >= worst_fit, idx, P))   # first worst
    do_replace = jnp.max(child_fit) < worst_fit
    repl = jnp.logical_and(idx == worst_idx, do_replace)           # (P, 1) bool

    newpop_ref[...] = jnp.where(jnp.broadcast_to(repl, (P, L)),
                                jnp.broadcast_to(child, (P, L)),
                                pop)
    newfit_ref[...] = jnp.where(repl,
                                jnp.broadcast_to(child_fit, (P, 1)),
                                pop_fit)


def replacement_forward(pop_genes, child_genes, dist):
    """pop_genes (B,P,L) int32, child_genes (B,L) int32, dist (N,N) f32 ->
       (new_pop (B,P,L) int32, new_fit (B,P,1) f32)."""
    b = pop_genes.shape[0]
    dist_flat = dist.astype(jnp.float32).reshape(1, N * N)   # free row-major flatten
    return pl.pallas_call(
        replacement_kernel,
        grid=(b,),
        in_specs=[
            pl.BlockSpec((None, P, L), lambda i: (i, 0, 0)),   # population
            pl.BlockSpec((None, 1, L), lambda i: (i, 0, 0)),   # child
            pl.BlockSpec((1, N * N), lambda i: (0, 0)),        # shared distances
        ],
        out_specs=(
            pl.BlockSpec((None, P, L), lambda i: (i, 0, 0)),   # new population
            pl.BlockSpec((None, P, 1), lambda i: (i, 0, 0)),   # new fitness
        ),
        out_shape=(jax.ShapeDtypeStruct((b, P, L), jnp.int32),
                   jax.ShapeDtypeStruct((b, P, 1), jnp.float32)),
        # New population aliases the incoming population buffer (P8 pattern);
        # a caller looping generations should additionally donate it.
        input_output_aliases={0: 0},
        compiler_params=pltpu.CompilerParams(
            dimension_semantics=("parallel",)),    # both TCs used on v7x
    )(pop_genes.astype(jnp.int32),
      child_genes.astype(jnp.int32).reshape(b, 1, L),
      dist_flat)


# ----------------------------- pure-JAX reference ----------------------------

def _ref_single(pop, child, dist):
    def tour_len(g):
        return dist[g, jnp.roll(g, -1)].sum()
    pop_fit = jax.vmap(tour_len)(pop)
    child_fit = tour_len(child)
    worst = jnp.argmax(pop_fit)
    replace = child_fit < pop_fit[worst]
    new_pop = pop.at[worst].set(jnp.where(replace, child, pop[worst]))
    new_fit = pop_fit.at[worst].set(jnp.where(replace, child_fit, pop_fit[worst]))
    return new_pop, new_fit[:, None]


def ref_forward(pop_genes, child_genes, dist):
    return jax.vmap(_ref_single, in_axes=(0, 0, None))(pop_genes, child_genes, dist)


if __name__ == "__main__":
    key = jax.random.PRNGKey(0)
    kpop, kchild, kcoord = jax.random.split(key, 3)

    # Deterministic batch of tour permutations (populations + children).
    pop_genes = jnp.stack(
        [jax.random.permutation(k, N) for k in jax.random.split(kpop, B * P)]
    ).reshape(B, P, L).astype(jnp.int32)
    child_genes = jnp.stack(
        [jax.random.permutation(k, N) for k in jax.random.split(kchild, B)]
    ).astype(jnp.int32)

    # Deterministic Euclidean city-distance matrix (distance_metric="euclidean").
    coords = jax.random.uniform(kcoord, (N, 2), dtype=jnp.float32)
    diff = coords[:, None, :] - coords[None, :, :]
    dist = jnp.sqrt(jnp.sum(diff * diff, axis=-1))

    # Compute the reference first (the kernel output aliases the pop buffer).
    ref_pop, ref_fit = ref_forward(pop_genes, child_genes, dist)
    jax.block_until_ready((ref_pop, ref_fit))

    fwd = jax.jit(replacement_forward)
    new_pop, new_fit = fwd(pop_genes, child_genes, dist)
    jax.block_until_ready((new_pop, new_fit))

    np.testing.assert_array_equal(np.asarray(new_pop), np.asarray(ref_pop))
    np.testing.assert_allclose(np.asarray(new_fit), np.asarray(ref_fit),
                               rtol=1e-5, atol=1e-5)

    print("KERNEL_OK")
</pallas_src>

<mosaic_0001>
module attributes {stable_mosaic.version = 11 : i64} {
  func.func @replacement_kernel(%arg0: i32, %arg1: memref<1x8x16xi32, #tpu.memory_space<vmem>>, %arg2: memref<1x1x16xi32, #tpu.memory_space<vmem>>, %arg3: memref<1x256xf32, #tpu.memory_space<vmem>>, %arg4: memref<1x8x16xi32, #tpu.memory_space<vmem>>, %arg5: memref<1x8x1xf32, #tpu.memory_space<vmem>>) attributes {dimension_semantics = [#tpu.dimension_semantics<parallel>], iteration_bounds = array<i64: 8>, scalar_prefetch = 0 : i64, scratch_operands = 0 : i64, tpu.core_type = #tpu.core_type<tc>, window_params = [{transform_indices = @transform_0, window_bounds = array<i64: 1, 8, 16>}, {transform_indices = @transform_1, window_bounds = array<i64: 1, 1, 16>}, {pipeline_mode = #tpu.pipeline_mode<synchronous>, transform_indices = @transform_2, window_bounds = array<i64: 1, 256>}, {transform_indices = @transform_3, window_bounds = array<i64: 1, 8, 16>}, {transform_indices = @transform_4, window_bounds = array<i64: 1, 8, 1>}]} {
    %c0 = arith.constant 0 : index
    %c0_0 = arith.constant 0 : index
    %c0_1 = arith.constant 0 : index
    %0 = vector.load %arg1[%c0, %c0_0, %c0_1] : memref<1x8x16xi32, #tpu.memory_space<vmem>>, vector<1x8x16xi32>
    %1 = vector.shape_cast %0 : vector<1x8x16xi32> to vector<8x16xi32>
    %c0_2 = arith.constant 0 : index
    %c0_3 = arith.constant 0 : index
    %c0_4 = arith.constant 0 : index
    %2 = vector.load %arg2[%c0_2, %c0_3, %c0_4] : memref<1x1x16xi32, #tpu.memory_space<vmem>>, vector<1x1x16xi32>
    %3 = vector.shape_cast %2 : vector<1x1x16xi32> to vector<1x16xi32>
    %c0_5 = arith.constant 0 : index
    %c0_6 = arith.constant 0 : index
    %4 = vector.load %arg3[%c0_5, %c0_6] : memref<1x256xf32, #tpu.memory_space<vmem>>, vector<1x256xf32>
    %5 = tpu.concatenate %1, %3 in 0 : vector<8x16xi32>, vector<1x16xi32> -> vector<9x16xi32>
    %6 = vector.extract_strided_slice %5 {offsets = [0, 1], sizes = [9, 15], strides = [1, 1]} : vector<9x16xi32> to vector<9x15xi32>
    %7 = vector.extract_strided_slice %5 {offsets = [0, 0], sizes = [9, 1], strides = [1, 1]} : vector<9x16xi32> to vector<9x1xi32>
    %8 = tpu.concatenate %6, %7 in 1 : vector<9x15xi32>, vector<9x1xi32> -> vector<9x16xi32>
    %c16_i32 = arith.constant 16 : i32
    %9 = vector.broadcast %c16_i32 : i32 to vector<9x16xi32>
    %10 = arith.muli %5, %9 : vector<9x16xi32>
    %11 = arith.addi %10, %8 : vector<9x16xi32>
    %12 = tpu.iota {dimensions = array<i32: 2>} : vector<9x16x256xi32>
    %13 = vector.shape_cast %11 : vector<9x16xi32> to vector<9x16x1xi32>
    %14 = vector.broadcast %13 : vector<9x16x1xi32> to vector<9x16x256xi32>
    %15 = arith.cmpi eq, %14, %12 : vector<9x16x256xi32>
    %16 = vector.shape_cast %4 : vector<1x256xf32> to vector<1x1x256xf32>
    %cst = arith.constant 0.000000e+00 : f32
    %17 = vector.shape_cast %16 : vector<1x1x256xf32> to vector<1x1x256xf32>
    %18 = vector.broadcast %17 : vector<1x1x256xf32> to vector<9x16x256xf32>
    %19 = vector.broadcast %cst : f32 to vector<9x16x256xf32>
    %20 = arith.select %15, %18, %19 : vector<9x16x256xi1>, vector<9x16x256xf32>
    %cst_7 = arith.constant dense<0.000000e+00> : vector<9x16xf32>
    %21 = vector.multi_reduction <add>, %20, %cst_7 [2] : vector<9x16x256xf32> to vector<9x16xf32>
    %cst_8 = arith.constant dense<0.000000e+00> : vector<9xf32>
    %22 = vector.multi_reduction <add>, %21, %cst_8 [1] : vector<9x16xf32> to vector<9xf32>
    %23 = vector.shape_cast %22 : vector<9xf32> to vector<9x1xf32>
    %24 = vector.extract_strided_slice %23 {offsets = [0, 0], sizes = [8, 1], strides = [1, 1]} : vector<9x1xf32> to vector<8x1xf32>
    %25 = vector.extract_strided_slice %23 {offsets = [8, 0], sizes = [1, 1], strides = [1, 1]} : vector<9x1xf32> to vector<1x1xf32>
    %26 = vector.shape_cast %24 : vector<8x1xf32> to vector<1x8x1xf32>
    %cst_9 = arith.constant dense<0xFF800000> : vector<1xf32>
    %27 = vector.multi_reduction <maximumf>, %26, %cst_9 [1, 2] : vector<1x8x1xf32> to vector<1xf32>
    %28 = vector.shape_cast %27 : vector<1xf32> to vector<1x1x1xf32>
    %29 = vector.extract %28[0, 0, 0] : f32 from vector<1x1x1xf32>
    %30 = tpu.iota {dimensions = array<i32: 0>} : vector<8x1xi32>
    %31 = vector.broadcast %29 : f32 to vector<8x1xf32>
    %32 = arith.cmpf oge, %24, %31 : vector<8x1xf32>
    %c8_i32 = arith.constant 8 : i32
    %33 = vector.broadcast %c8_i32 : i32 to vector<8x1xi32>
    %34 = arith.select %32, %30, %33 : vector<8x1xi1>, vector<8x1xi32>
    %35 = vector.shape_cast %34 : vector<8x1xi32> to vector<1x8x1xi32>
    %cst_10 = arith.constant dense<2147483647> : vector<1xi32>
    %36 = vector.multi_reduction <minsi>, %35, %cst_10 [1, 2] : vector<1x8x1xi32> to vector<1xi32>
    %37 = vector.shape_cast %36 : vector<1xi32> to vector<1x1x1xi32>
    %38 = vector.extract %37[0, 0, 0] : i32 from vector<1x1x1xi32>
    %39 = vector.shape_cast %25 : vector<1x1xf32> to vector<1x1x1xf32>
    %cst_11 = arith.constant dense<0xFF800000> : vector<1xf32>
    %40 = vector.multi_reduction <maximumf>, %39, %cst_11 [1, 2] : vector<1x1x1xf32> to vector<1xf32>
    %41 = vector.shape_cast %40 : vector<1xf32> to vector<1x1x1xf32>
    %42 = vector.extract %41[0, 0, 0] : f32 from vector<1x1x1xf32>
    %43 = arith.cmpf olt, %42, %29 : f32
    %44 = vector.broadcast %38 : i32 to vector<8x1xi32>
    %45 = arith.cmpi eq, %30, %44 : vector<8x1xi32>
    %46 = vector.broadcast %43 : i1 to vector<8x1xi1>
    %47 = arith.andi %45, %46 : vector<8x1xi1>
    %48 = vector.shape_cast %47 : vector<8x1xi1> to vector<8x1xi1>
    %49 = vector.broadcast %48 : vector<8x1xi1> to vector<8x16xi1>
    %50 = vector.shape_cast %3 : vector<1x16xi32> to vector<1x16xi32>
    %51 = vector.broadcast %50 : vector<1x16xi32> to vector<8x16xi32>
    %52 = arith.select %49, %51, %1 : vector<8x16xi1>, vector<8x16xi32>
    %c0_12 = arith.constant 0 : index
    %c0_13 = arith.constant 0 : index
    %c0_14 = arith.constant 0 : index
    %53 = vector.load %arg4[%c0_12, %c0_13, %c0_14] : memref<1x8x16xi32, #tpu.memory_space<vmem>>, vector<1x8x16xi32>
    %54 = vector.shape_cast %53 : vector<1x8x16xi32> to vector<8x16xi32>
    %55 = vector.shape_cast %52 : vector<8x16xi32> to vector<1x8x16xi32>
    tpu.vector_store %arg4[%c0_12, %c0_13, %c0_14], %55 {strides = array<i32>} : memref<1x8x16xi32, #tpu.memory_space<vmem>>, vector<1x8x16xi32>,
    %56 = vector.shape_cast %25 : vector<1x1xf32> to vector<1x1xf32>
    %57 = vector.broadcast %56 : vector<1x1xf32> to vector<8x1xf32>
    %58 = arith.select %47, %57, %24 : vector<8x1xi1>, vector<8x1xf32>
    %c0_15 = arith.constant 0 : index
    %c0_16 = arith.constant 0 : index
    %c0_17 = arith.constant 0 : index
    %59 = vector.load %arg5[%c0_15, %c0_16, %c0_17] : memref<1x8x1xf32, #tpu.memory_space<vmem>>, vector<1x8x1xf32>
    %60 = vector.shape_cast %59 : vector<1x8x1xf32> to vector<8x1xf32>
    %61 = vector.shape_cast %58 : vector<8x1xf32> to vector<1x8x1xf32>
    tpu.vector_store %arg5[%c0_15, %c0_16, %c0_17], %61 {strides = array<i32>} : memref<1x8x1xf32, #tpu.memory_space<vmem>>, vector<1x8x1xf32>,
    return
  }
  func.func @transform_0(%arg0: i32) -> (i32, i32, i32) {
    %c0_i32 = arith.constant 0 : i32
    %c0_i32_0 = arith.constant 0 : i32
    %c0_i32_1 = arith.constant 0 : i32
    return %arg0, %c0_i32, %c0_i32_0 : i32, i32, i32
  }
  func.func @transform_1(%arg0: i32) -> (i32, i32, i32) {
    %c0_i32 = arith.constant 0 : i32
    %c0_i32_0 = arith.constant 0 : i32
    %c0_i32_1 = arith.constant 0 : i32
    return %arg0, %c0_i32, %c0_i32_0 : i32, i32, i32
  }
  func.func @transform_2(%arg0: i32) -> (i32, i32) {
    %c0_i32 = arith.constant 0 : i32
    %c0_i32_0 = arith.constant 0 : i32
    %c0_i32_1 = arith.constant 0 : i32
    return %c0_i32, %c0_i32_0 : i32, i32
  }
  func.func @transform_3(%arg0: i32) -> (i32, i32, i32) {
    %c0_i32 = arith.constant 0 : i32
    %c0_i32_0 = arith.constant 0 : i32
    %c0_i32_1 = arith.constant 0 : i32
    return %arg0, %c0_i32, %c0_i32_0 : i32, i32, i32
  }
  func.func @transform_4(%arg0: i32) -> (i32, i32, i32) {
    %c0_i32 = arith.constant 0 : i32
    %c0_i32_0 = arith.constant 0 : i32
    %c0_i32_1 = arith.constant 0 : i32
    return %arg0, %c0_i32, %c0_i32_0 : i32, i32, i32
  }
}

</mosaic_0001>

<bundles_post_ra>
// kernel: replacement_forward.1
= control target key start
LH: loop header
LB: loop body
LE: loop exit
PB: predicated region body
PF: predicated region fallthrough
CT: control target
= control target key end

     0   :  { %s799_s15 = smov 0   ;;  %s987_s0 = inlined_call_operand.vmem [shape: s32[8,8,16], index: 0, kind: input, shape index: {}, may-alias: {0,3}]   ;;  %s988_s1 = inlined_call_operand.vmem [shape: s32[8,1,16], index: 1, kind: input, shape index: {}]   ;;  %s989_s2 = inlined_call_operand.vmem [shape: f32[1,256], index: 2, kind: input, shape index: {}]   ;;  %s990_s3 = inlined_call_operand.vmem [shape: s32[8,8,16], index: 3, kind: output, shape index: {0}, may-alias: {0,3}]   ;;  %s991_s4 = inlined_call_operand.vmem [shape: f32[8,8,1], index: 4, kind: output, shape index: {1}]  }
   0x1 LB: > { %s738_s16 = sadd.s32 4294967295, %s770_s15   ;;  %p742_p0 = scmp.ge.s32.totalorder %s770_s15, 1  ;;  %s770_s15 = sphi %s799_s15, %s15_s15  }
   0x2   : > { %p172_p1 = scmp.lt.s32.totalorder %s770_s15, 9 }
   0x4   : > { %p173_p2 = pnand %p742_p0, %p172_p1 }
   0x5   : > { %p203_p3 = scmp.lt.s32.totalorder (!%p173_p2), %s738_s16, 7  ;;  %s772_s21 = smov (!%p173_p2), 127  }
   0x6   : > { %176 = sbr.rel (%p173_p2) target bundleno = 777 (0x309), region = 32  ;;  %s773_s25 = smov (!%p173_p2), 15  }
   0xb   : > { %s993_s16 = smov (!%p203_p3, %s738_s16), 7  ;;  %v236_v2 = vlaneseq  ;;  %vm229_vm0 = vcmask 121856   ;;  %v220_v27 = vld [vmem:[%s989_s2] sm:$0x3] }
   0xc   : > { %s807_s17 = sshll.u32 %s993_s16, 3  ;;  %s209_s24 = scalar_lea.vmem %s988_s1, %s993_s16 }
   0xd   : > { %s206_s20 = scalar_lea.vmem %s987_s0, %s807_s17  ;;  %v821_v1 = vld [vmem:[%s209_s24] sm:$0x1]  ;;  %v824_v4 = vshrl.u32 %v236_v2, 7  ;;  %v841_v25 = vand.u32 127, %v236_v2  ;;  %s213_s8 = scalar_lea.vmem %s990_s3, %s807_s17 }
   0xe   : > { %v813_v0 = vld [vmem:[%s206_s20] sm:$0xff]  ;;  %s217_s11 = scalar_lea.vmem %s991_s4, %s807_s17 }
   0xf   : > { %221 = vrot.lane.b32.xlu0 %v813_v0, %s772_s21  ;;  %v232_v5 = vmul.u32 16, %v813_v0  ;;  %v828_v7 = vsub.s32 0, %v824_v4  ;;  %v252_v8 = vsub.s32 1, %v824_v4  ;;  %v263_v13 = vsub.s32 2, %v824_v4 }
  0x10   : > { %v274_v15 = vsub.s32 3, %v824_v4  ;;  %v285_v17 = vsub.s32 4, %v824_v4  ;;  %v296_v19 = vsub.s32 5, %v824_v4  ;;  %v307_v21 = vsub.s32 6, %v824_v4 }
  0x11   : > { %v318_v23 = vsub.s32 7, %v824_v4  ;;  %v849_v28 = vadd.s32 128, %v841_v25  ;;  %v852_v29 = vrot.slane %v220_v27, %v828_v7  ;;  %v854_v30 = vrot.slane %v220_v27, %v252_v8 }
  0x13   : > { %225 = vrot.lane.b32.xlu0 %v813_v0, %s773_s25 }
  0x17   : > { %223 = vrot.lane.b32.xlu0 %v821_v1, %s772_s21 }
  0x81   : > { %v222_v3 = vpop.permute.xlu0 %221 }
  0x85   : > { %v226_v6 = vpop.permute.xlu0 %225 }
  0x86   : > { %v230_v9 = vsel %vm229_vm0, %v222_v3, %v226_v6 }
  0x87   : > { %v234_v10 = vadd.s32 %v232_v5, %v230_v9 }
  0x89   : > { %v253_v11 = vrot.slane %v234_v10, %v252_v8  ;;  %v242_v12 = vrot.slane %v234_v10, %v828_v7  ;;  %v264_v14 = vrot.slane %v234_v10, %v263_v13  ;;  %v275_v16 = vrot.slane %v234_v10, %v274_v15  ;;  %v843_v26 = vpop.permute.xlu0 %223 }
  0x8a   : > { %v286_v18 = vrot.slane %v234_v10, %v285_v17  ;;  %v297_v20 = vrot.slane %v234_v10, %v296_v19  ;;  %v308_v22 = vrot.slane %v234_v10, %v307_v21  ;;  %v319_v24 = vrot.slane %v234_v10, %v318_v23 }
  0x8b   : > { %255 = vbcast.lane.b32.xlu0 %v253_v11, 256  ;;  %244 = vbcast.lane.b32.xlu1 %v242_v12, 256 }
  0x8f   : > { %266 = vbcast.lane.b32.xlu0 %v264_v14, 256  ;;  %248 = vbcast.lane.b32.xlu1 %v242_v12, 264 }
  0x93   : > { %277 = vbcast.lane.b32.xlu0 %v275_v16, 256  ;;  %259 = vbcast.lane.b32.xlu1 %v253_v11, 264 }
  0x97   : > { %288 = vbcast.lane.b32.xlu0 %v286_v18, 256  ;;  %270 = vbcast.lane.b32.xlu1 %v264_v14, 264 }
  0x9b   : > { %299 = vbcast.lane.b32.xlu0 %v297_v20, 256  ;;  %281 = vbcast.lane.b32.xlu1 %v275_v16, 264 }
  0x9f   : > { %310 = vbcast.lane.b32.xlu0 %v308_v22, 256  ;;  %292 = vbcast.lane.b32.xlu1 %v286_v18, 264 }
  0xa3   : > { %321 = vbcast.lane.b32.xlu0 %v319_v24, 256  ;;  %303 = vbcast.lane.b32.xlu1 %v297_v20, 264 }
  0xa7   : > { %314 = vbcast.lane.b32.xlu1 %v308_v22, 264 }
  0xab   : > { %325 = vbcast.lane.b32.xlu1 %v319_v24, 264 }
  0xaf   : > { %227 = vrot.lane.b32.xlu1 %v821_v1, %s773_s25 }
  0xfd   : > { %v256_v31 = vpop.permute.xlu0 %255  ;;  %v245_v32 = vpop.permute.xlu1 %244 }
  0xfe   : > { %vm342_vm1 = vcmp.eq.s32.totalorder %v256_v31, %v841_v25  ;;  %vm343_vm2 = vcmp.eq.s32.totalorder %v256_v31, %v849_v28  ;;  %vm338_vm3 = vcmp.eq.s32.totalorder %v245_v32, %v841_v25  ;;  %vm339_vm4 = vcmp.eq.s32.totalorder %v245_v32, %v849_v28 }
  0xff   : > { %v385_v33 = vsel %vm338_vm3, %v852_v29, 0.0  ;;  %v386_v34 = vsel %vm339_vm4, %v854_v30, 0.0  ;;  %v389_v38 = vsel %vm342_vm1, %v852_v29, 0.0  ;;  %v390_v39 = vsel %vm343_vm2, %v854_v30, 0.0 }
 0x100   : > { %v421_v35 = vadd.f32 %v386_v34, %v385_v33  ;;  %v427_v42 = vadd.f32 %v390_v39, %v389_v38 }
 0x101   : > { %v267_v36 = vpop.permute.xlu0 %266  ;;  %v249_v37 = vpop.permute.xlu1 %248 }
 0x102   : > { %vm340_vm5 = vcmp.eq.s32.totalorder %v249_v37, %v841_v25  ;;  %vm341_vm6 = vcmp.eq.s32.totalorder %v249_v37, %v849_v28  ;;  %422 = vadd.xlane.f32.xlu0 %v421_v35  ;;  %vm346_vm7 = vcmp.eq.s32.totalorder %v267_v36, %v841_v25  ;;  %vm347_vm8 = vcmp.eq.s32.totalorder %v267_v36, %v849_v28 }
 0x103   : > { %v387_v40 = vsel %vm340_vm5, %v852_v29, 0.0  ;;  %v388_v41 = vsel %vm341_vm6, %v854_v30, 0.0  ;;  %v393_v46 = vsel %vm346_vm7, %v852_v29, 0.0  ;;  %v394_v47 = vsel %vm347_vm8, %v854_v30, 0.0 }
 0x104   : > { %v424_v43 = vadd.f32 %v388_v41, %v387_v40  ;;  %v433_v53 = vadd.f32 %v394_v47, %v393_v46  ;;  %v233_v41 = vmul.u32 16, %v821_v1 }
 0x105   : > { %v278_v44 = vpop.permute.xlu0 %277  ;;  %v260_v45 = vpop.permute.xlu1 %259 }
 0x106   : > { %vm344_vm9 = vcmp.eq.s32.totalorder %v260_v45, %v841_v25  ;;  %vm345_vm10 = vcmp.eq.s32.totalorder %v260_v45, %v849_v28  ;;  %428 = vadd.xlane.f32.xlu0 %v427_v42  ;;  %vm350_vm11 = vcmp.eq.s32.totalorder %v278_v44, %v841_v25  ;;  %vm351_vm12 = vcmp.eq.s32.totalorder %v278_v44, %v849_v28 }
 0x107   : > { %425 = vadd.xlane.f32.xlu1 %v424_v43  ;;  %v391_v48 = vsel %vm344_vm9, %v852_v29, 0.0  ;;  %v392_v49 = vsel %vm345_vm10, %v854_v30, 0.0  ;;  %v397_v54 = vsel %vm350_vm11, %v852_v29, 0.0  ;;  %v398_v55 = vsel %vm351_vm12, %v854_v30, 0.0 }
 0x108   : > { %v430_v50 = vadd.f32 %v392_v49, %v391_v48  ;;  %v439_v61 = vadd.f32 %v398_v55, %v397_v54 }
 0x109   : > { %v289_v51 = vpop.permute.xlu0 %288  ;;  %v271_v52 = vpop.permute.xlu1 %270 }
 0x10a   : > { %vm348_vm13 = vcmp.eq.s32.totalorder %v271_v52, %v841_v25  ;;  %vm349_vm14 = vcmp.eq.s32.totalorder %v271_v52, %v849_v28  ;;  %431 = vadd.xlane.f32.xlu0 %v430_v50  ;;  %vm354_vm15 = vcmp.eq.s32.totalorder %v289_v51, %v841_v25  ;;  %vm355_vm1 = vcmp.eq.s32.totalorder %v289_v51, %v849_v28 }
 0x10b   : > { %434 = vadd.xlane.f32.xlu1 %v433_v53  ;;  %v395_v56 = vsel %vm348_vm13, %v852_v29, 0.0  ;;  %v396_v57 = vsel %vm349_vm14, %v854_v30, 0.0  ;;  %v401_v62 = vsel %vm354_vm15, %v852_v29, 0.0  ;;  %v402_v63 = vsel %vm355_vm1, %v854_v30, 0.0 }
 0x10c   : > { %v436_v58 = vadd.f32 %v396_v57, %v395_v56  ;;  %v445_v9 = vadd.f32 %v402_v63, %v401_v62  ;;  %v497_v53 = vadd.s32 4294967288, %v841_v25  ;;  %v930_v57 = vsub.s32 %v841_v25, %v824_v4 }
 0x10d   : > { %v300_v59 = vpop.permute.xlu0 %299  ;;  %v282_v60 = vpop.permute.xlu1 %281 }
 0x10e   : > { %vm352_vm2 = vcmp.eq.s32.totalorder %v282_v60, %v841_v25  ;;  %vm353_vm3 = vcmp.eq.s32.totalorder %v282_v60, %v849_v28  ;;  %437 = vadd.xlane.f32.xlu0 %v436_v58  ;;  %vm358_vm4 = vcmp.eq.s32.totalorder %v300_v59, %v841_v25  ;;  %vm359_vm5 = vcmp.eq.s32.totalorder %v300_v59, %v849_v28 }
 0x10f   : > { %440 = vadd.xlane.f32.xlu1 %v439_v61  ;;  %v399_v2 = vsel %vm352_vm2, %v852_v29, 0.0  ;;  %v400_v3 = vsel %vm353_vm3, %v854_v30, 0.0  ;;  %v405_v10 = vsel %vm358_vm4, %v852_v29, 0.0  ;;  %v406_v11 = vsel %vm359_vm5, %v854_v30, 0.0 }
 0x110   : > { %v442_v5 = vadd.f32 %v400_v3, %v399_v2  ;;  %v451_v17 = vadd.f32 %v406_v11, %v405_v10  ;;  %v926_v56 = vsub.s32 %v497_v53, %v824_v4  ;;  %vm576_vm3 = vcmask 1041409  }
 0x111   : > { %v311_v6 = vpop.permute.xlu0 %310  ;;  %v293_v8 = vpop.permute.xlu1 %292  ;;  %vm578_vm4 = vcmask 1042434   ;;  %vm580_vm5 = vcmask 1043459  }
 0x112   : > { %vm356_vm6 = vcmp.eq.s32.totalorder %v293_v8, %v841_v25  ;;  %vm357_vm7 = vcmp.eq.s32.totalorder %v293_v8, %v849_v28  ;;  %443 = vadd.xlane.f32.xlu0 %v442_v5  ;;  %vm362_vm8 = vcmp.eq.s32.totalorder %v311_v6, %v841_v25  ;;  %vm363_vm9 = vcmp.eq.s32.totalorder %v311_v6, %v849_v28 }
 0x113   : > { %446 = vadd.xlane.f32.xlu1 %v445_v9  ;;  %v403_v12 = vsel %vm356_vm6, %v852_v29, 0.0  ;;  %v404_v13 = vsel %vm357_vm7, %v854_v30, 0.0  ;;  %v409_v18 = vsel %vm362_vm8, %v852_v29, 0.0  ;;  %v410_v19 = vsel %vm363_vm9, %v854_v30, 0.0 }
 0x114   : > { %v448_v14 = vadd.f32 %v404_v13, %v403_v12  ;;  %v457_v24 = vadd.f32 %v410_v19, %v409_v18  ;;  %vm582_vm6 = vcmask 1044484   ;;  %vm584_vm7 = vcmask 1045509  }
 0x115   : > { %v322_v15 = vpop.permute.xlu0 %321  ;;  %v304_v16 = vpop.permute.xlu1 %303  ;;  %vm586_vm8 = vcmask 1046534   ;;  %vm588_vm9 = vcmask 1047559  }
 0x116   : > { %vm360_vm10 = vcmp.eq.s32.totalorder %v304_v16, %v841_v25  ;;  %vm361_vm11 = vcmp.eq.s32.totalorder %v304_v16, %v849_v28  ;;  %449 = vadd.xlane.f32.xlu0 %v448_v14  ;;  %vm366_vm12 = vcmp.eq.s32.totalorder %v322_v15, %v841_v25  ;;  %vm367_vm13 = vcmp.eq.s32.totalorder %v322_v15, %v849_v28 }
 0x117   : > { %452 = vadd.xlane.f32.xlu1 %v451_v17  ;;  %v407_v20 = vsel %vm360_vm10, %v852_v29, 0.0  ;;  %v408_v21 = vsel %vm361_vm11, %v854_v30, 0.0  ;;  %v413_v27 = vsel %vm366_vm12, %v852_v29, 0.0  ;;  %v414_v31 = vsel %vm367_vm13, %v854_v30, 0.0 }
 0x118   : > { %v454_v22 = vadd.f32 %v408_v21, %v407_v20  ;;  %v463_v36 = vadd.f32 %v414_v31, %v413_v27  ;;  %vm592_vm12 = vcmask 130048  }
 0x119   : > { %v315_v23 = vpop.permute.xlu1 %314 }
 0x11a   : > { %vm364_vm14 = vcmp.eq.s32.totalorder %v315_v23, %v841_v25  ;;  %vm365_vm15 = vcmp.eq.s32.totalorder %v315_v23, %v849_v28  ;;  %455 = vadd.xlane.f32.xlu0 %v454_v22 }
 0x11b   : > { %458 = vadd.xlane.f32.xlu1 %v457_v24  ;;  %v411_v32 = vsel %vm364_vm14, %v852_v29, 0.0  ;;  %v412_v33 = vsel %vm365_vm15, %v854_v30, 0.0  ;;  %vm596_vm15 = vcmask 122880  }
 0x11c   : > { %v460_v34 = vadd.f32 %v412_v33, %v411_v32 }
 0x11d   : > { %v326_v35 = vpop.permute.xlu1 %325 }
 0x11e   : > { %vm368_vm1 = vcmp.eq.s32.totalorder %v326_v35, %v841_v25  ;;  %vm369_vm2 = vcmp.eq.s32.totalorder %v326_v35, %v849_v28  ;;  %461 = vadd.xlane.f32.xlu0 %v460_v34 }
 0x11f   : > { %464 = vadd.xlane.f32.xlu1 %v463_v36  ;;  %v415_v37 = vsel %vm368_vm1, %v852_v29, 0.0  ;;  %v416_v38 = vsel %vm369_vm2, %v854_v30, 0.0 }
 0x120   : > { %v466_v39 = vadd.f32 %v416_v38, %v415_v37 }
 0x121   : > { %v228_v40 = vpop.permute.xlu1 %227 }
 0x122   : > { %467 = vadd.xlane.f32.xlu0 %v466_v39  ;;  %v231_v42 = vsel %vm229_vm0, %v843_v26, %v228_v40  ;;  %vm502_vm0 = vcmask 130112  }
 0x123   : > { %v235_v43 = vadd.s32 %v233_v41, %v231_v42 }
 0x125   : > { %v330_v44 = vrot.slane %v235_v43, %v828_v7 }
 0x130   : > { %332 = vbcast.lane.b32.xlu1 %v330_v44, 256 }
 0x138   : > { %336 = vbcast.lane.b32.xlu0 %v330_v44, 264 }
 0x18b   : > { %v423_v45 = vpop.xlane.xlu0 %422 }
 0x18c   : > { %v496_v6 = vrot.slane %v423_v45, %v930_v57 }
 0x18f   : > { %v429_v46 = vpop.xlane.xlu0 %428 }
 0x190   : > { %v426_v47 = vpop.xlane.xlu1 %425  ;;  %v507_v61 = vrot.slane %v429_v46, %v930_v57 }
 0x191   : > { %v501_v62 = vrot.slane %v426_v47, %v926_v56 }
 0x193   : > { %v432_v48 = vpop.xlane.xlu0 %431  ;;  %v503_v14 = vsel %vm502_vm0, %v501_v62, %v496_v6 }
 0x194   : > { %v435_v49 = vpop.xlane.xlu1 %434  ;;  %v511_v58 = vrot.slane %v432_v48, %v926_v56 }
 0x195   : > { %v516_v3 = vrot.slane %v435_v49, %v930_v57 }
 0x196   : > { %v512_v8 = vsel %vm502_vm0, %v511_v58, %v507_v61 }
 0x197   : > { %v438_v50 = vpop.xlane.xlu0 %437  ;;  %v577_v19 = vsel %vm576_vm3, %v512_v8, %v503_v14 }
 0x198   : > { %v441_v51 = vpop.xlane.xlu1 %440  ;;  %v520_v59 = vrot.slane %v438_v50, %v926_v56 }
 0x199   : > { %v525_v9 = vrot.slane %v441_v51, %v930_v57 }
 0x19a   : > { %v521_v11 = vsel %vm502_vm0, %v520_v59, %v516_v3 }
 0x19b   : > { %v444_v52 = vpop.xlane.xlu0 %443  ;;  %v579_v22 = vsel %vm578_vm4, %v521_v11, %v577_v19 }
 0x19c   : > { %v447_v54 = vpop.xlane.xlu1 %446  ;;  %v529_v63 = vrot.slane %v444_v52, %v926_v56 }
 0x19d   : > { %v534_v12 = vrot.slane %v447_v54, %v930_v57 }
 0x19e   : > { %v530_v15 = vsel %vm502_vm0, %v529_v63, %v525_v9 }
 0x19f   : > { %v450_v55 = vpop.xlane.xlu0 %449  ;;  %v581_v24 = vsel %vm580_vm5, %v530_v15, %v579_v22 }
 0x1a0   : > { %v453_v26 = vpop.xlane.xlu1 %452  ;;  %v538_v5 = vrot.slane %v450_v55, %v926_v56 }
 0x1a1   : > { %v543_v16 = vrot.slane %v453_v26, %v930_v57 }
 0x1a2   : > { %v539_v20 = vsel %vm502_vm0, %v538_v5, %v534_v12  ;;  %v635_v5 = vrot.slane %v821_v1, %v828_v7 }
 0x1a3   : > { %v456_v60 = vpop.xlane.xlu0 %455  ;;  %v583_v32 = vsel %vm582_vm6, %v539_v20, %v581_v24  ;;  %vm643_vm6 = vcmask 7168  }
 0x1a4   : > { %v459_v2 = vpop.xlane.xlu1 %458  ;;  %v547_v10 = vrot.slane %v456_v60, %v926_v56 }
 0x1a5   : > { %v552_v21 = vrot.slane %v459_v2, %v930_v57 }
 0x1a6   : > { %v548_v23 = vsel %vm502_vm0, %v547_v10, %v543_v16 }
 0x1a7   : > { %v462_v13 = vpop.xlane.xlu0 %461  ;;  %v585_v36 = vsel %vm584_vm7, %v548_v23, %v583_v32 }
 0x1a8   : > { %v556_v17 = vrot.slane %v462_v13, %v926_v56  ;;  %v465_v18 = vpop.xlane.xlu1 %464 }
 0x1a9   : > { %v561_v33 = vrot.slane %v465_v18, %v930_v57 }
 0x1aa   : > { %v557_v27 = vsel %vm502_vm0, %v556_v17, %v552_v21 }
 0x1ab   : > { %v468_v31 = vpop.xlane.xlu0 %467  ;;  %v587_v40 = vsel %vm586_vm8, %v557_v27, %v585_v36 }
 0x1ac   : > { %v565_v34 = vrot.slane %v468_v31, %v926_v56  ;;  %v333_v35 = vpop.permute.xlu1 %332 }
 0x1ad   : > { %vm370_vm10 = vcmp.eq.s32.totalorder %v333_v35, %v841_v25  ;;  %vm371_vm11 = vcmp.eq.s32.totalorder %v333_v35, %v849_v28 }
 0x1ae   : > { %v417_v37 = vsel %vm370_vm10, %v852_v29, 0.0  ;;  %v418_v38 = vsel %vm371_vm11, %v854_v30, 0.0  ;;  %v566_v39 = vsel %vm502_vm0, %v565_v34, %v561_v33 }
 0x1af   : > { %v337_v41 = vpop.permute.xlu0 %336  ;;  %v469_v42 = vadd.f32 %v418_v38, %v417_v37  ;;  %v589_v43 = vsel %vm588_vm9, %v566_v39, %v587_v40 }
 0x1b0   : > { %vm372_vm13 = vcmp.eq.s32.totalorder %v337_v41, %v841_v25  ;;  %vm373_vm14 = vcmp.eq.s32.totalorder %v337_v41, %v849_v28  ;;  %v593_v44 = vsel %vm592_vm12, %v589_v43, 0.0 }
 0x1b1   : > { %470 = vadd.xlane.f32.xlu0 %v469_v42  ;;  %594 = vadd.xlane.f32.xlu1 %v593_v44  ;;  %v419_v45 = vsel %vm372_vm13, %v852_v29, 0.0  ;;  %v420_v46 = vsel %vm373_vm14, %v854_v30, 0.0 }
 0x1b2   : > { %v472_v47 = vadd.f32 %v420_v46, %v419_v45 }
 0x1b5   : > { %473 = vadd.xlane.f32.xlu1 %v472_v47 }
 0x23a   : > { %v595_v48 = vpop.xlane.xlu1 %594  ;;  %v471_v50 = vpop.xlane.xlu0 %470 }
 0x23b   : > { %v600_v49 = vrot.slane %v595_v48, 4  ;;  %v570_v53 = vrot.slane %v471_v50, %v930_v57 }
 0x23d   : > { %v601_v51 = vmax.f32 %v595_v48, %v600_v49 }
 0x23e   : > { %v474_v52 = vpop.xlane.xlu1 %473 }
 0x23f   : > { %v574_v25 = vrot.slane %v474_v52, %v926_v56  ;;  %v602_v28 = vrot.slane %v601_v51, 2 }
 0x241   : > { %v575_v54 = vsel %vm502_vm0, %v574_v25, %v570_v53  ;;  %v603_v55 = vmax.f32 %v601_v51, %v602_v28 }
 0x242   : > { %v597_v26 = vsel %vm596_vm15, %v575_v54, 0.0 }
 0x243   : > { %598 = vadd.xlane.f32.xlu0 %v597_v26  ;;  %v604_v29 = vrot.slane %v603_v55, 1 }
 0x245   : > { %v605_v30 = vmax.f32 %v603_v55, %v604_v29 }
 0x247   : > { %748 = vpush %v605_v30 }
 0x278   : > { %s749_s28 = spop %748 }
 0x279   : > { %v609_v58 = vstv %s749_s28 }
 0x27a   : > { %vm610_vm1 = vcmp.ge.f32.partialorder %v595_v48, %v609_v58 }
 0x27b   : > { %v611_v59 = vsel %vm610_vm1, %v824_v4, 8 }
 0x27c   : > { %v612_v60 = vrot.slane %v611_v59, 4 }
 0x27e   : > { %vm613_vm2 = vcmp.lt.s32.totalorder %v611_v59, %v612_v60 }
 0x27f   : > { %v614_v57 = vsel %vm613_vm2, %v611_v59, %v612_v60 }
 0x280   : > { %v615_v61 = vrot.slane %v614_v57, 2 }
 0x282   : > { %vm616_vm3 = vcmp.lt.s32.totalorder %v614_v57, %v615_v61 }
 0x283   : > { %v617_v56 = vsel %vm616_vm3, %v614_v57, %v615_v61 }
 0x284   : > { %v618_v62 = vrot.slane %v617_v56, 1 }
 0x286   : > { %vm619_vm0 = vcmp.lt.s32.totalorder %v617_v56, %v618_v62 }
 0x287   : > { %v620_v63 = vsel %vm619_vm0, %v617_v56, %v618_v62 }
 0x288   : > { %750 = vpush %v620_v63 }
 0x2b9   : > { %s751_s29 = spop %750 }
 0x2ba   : > { %v624_v3 = vstv %s751_s29 }
 0x2bb   : > { %vm625_vm4 = vcmp.eq.s32.totalorder %v824_v4, %v624_v3 }
 0x2cc   : > { %v599_v2 = vpop.xlane.xlu0 %598 }
 0x2cd   : > { %752 = vpush %v599_v2  ;;  %v641_v8 = vrot.slane %v599_v2, %v828_v7 }
 0x2fe   : > { %s753_s30 = spop %752 }
 0x2ff   : > { %p623_p4 = scmp.lt.f32.partialorder %s753_s30, %s749_s28 }
 0x301   : > { %s626_s5 = scalar_select %p623_p4, 1, 0 }
 0x303   : > { %v627_v6 = vstv %s626_s5 }
 0x304   : > { %vm628_vm5 = vcmp.eq.s32.totalorder %v627_v6, 1 }
 0x305   : > { %vm629_vm7 = vmand %vm625_vm4, %vm628_vm5 }
 0x306   : > { %v636_v9 = vsel %vm629_vm7, %v635_v5, %v813_v0  ;;  %v642_v10 = vsel %vm629_vm7, %v641_v8, %v595_v48 }
 0x307   : > { %637 = vst.msk [vmem:[%s213_s8] sm:$0xff] %vm592_vm12, %v636_v9 }
 0x308   : > { %644 = vst.msk [vmem:[%s217_s11] sm:$0xff] %vm643_vm6, %v642_v10 }
 0x309 PF: > { %s15_s15 = sadd.s32 1, %s770_s15  }
 0x30a   : > { %p12_p5 = scmp.ge.s32.totalorder %s15_s15, 10  }
 0x30c   :  { %14 = sbr.rel (!%p12_p5) target bundleno = 1 (0x1), region = 77 }

</bundles_post_ra>
